<compile_context>
chip_gen: v5e
topology: v5e:2x2
jax: 0.10.0
libtpu: 0.0.40
codegen_flags: <defaults>
</compile_context>

<pallas_src>
import functools

import jax
import jax.numpy as jnp
from jax.experimental import pallas as pl
from jax.experimental.pallas import tpu as pltpu

_SUBLANE = 8  # f32 sublane count


def _round_up(x, m):
    return ((x + m - 1) // m) * m


def _actor_kernel(x_ref, w1_ref, b1_ref, w2_ref, b2_ref, w3_ref, b3_ref, o_ref):
    # Layer 1: f32 MXU matmul + f32 bias-add / ReLU on the VPU.
    h1 = jnp.dot(x_ref[...], w1_ref[...], preferred_element_type=jnp.float32)
    h1 = jnp.maximum(h1 + b1_ref[...], 0.0)
    # Layer 2.
    h2 = jnp.dot(h1, w2_ref[...], preferred_element_type=jnp.float32)
    h2 = jnp.maximum(h2 + b2_ref[...], 0.0)
    # Layer 3 + tanh (tanh runs on the EUP).
    h3 = jnp.dot(h2, w3_ref[...], preferred_element_type=jnp.float32)
    o_ref[...] = jnp.tanh(h3 + b3_ref[...]).astype(o_ref.dtype)


def _reference_mlp(state, w1, b1, w2, b2, w3, b3):
    """Pure-JAX forward (also used as the small-batch fast path)."""
    h1 = jnp.maximum(state @ w1 + b1, 0.0)
    h2 = jnp.maximum(h1 @ w2 + b2, 0.0)
    return jnp.tanh(h2 @ w3 + b3)


@functools.partial(jax.jit, static_argnames=("block_b", "small_batch_threshold"))
def actor_forward(state, w1, b1, w2, b2, w3, b3, *, block_b=2048,
                  small_batch_threshold=64):
    """Fused forward pass of the Actor MLP.

    state: (B, input_size) float32
    w1: (input_size, hidden), b1: (1, hidden)
    w2: (hidden, hidden),     b2: (1, hidden)
    w3: (hidden, output),     b3: (1, output)
    returns: (B, output) float32 in [-1, 1]
    """
    B, in_size = state.shape
    hidden = w1.shape[1]
    out_size = w3.shape[1]

    # Small-batch fast path: launch + streaming overhead dominates; let XLA fuse it.
    if B <= small_batch_threshold:
        return _reference_mlp(state, w1, b1, w2, b2, w3, b3)

    # Batch tile: as large as block_b allows (amortizes ~600-cycle grid-step overhead).
    tb = min(block_b, _round_up(B, _SUBLANE))
    # Ensure >= 2 grid steps when possible so "parallel" can shard across v7x's 2 TCs.
    if B > _SUBLANE and pl.cdiv(B, tb) < 2:
        tb = max(_SUBLANE, _round_up(pl.cdiv(B, 2), _SUBLANE))
    grid = (pl.cdiv(B, tb),)

    # VMEM budget from the actual working set (resident weights/biases, double-buffered
    # state/output tiles, f32 activations), 3x headroom, capped under v7x's 64 MiB.
    weight_bytes = 4 * (in_size * hidden + hidden * hidden + hidden * out_size
                        + 2 * hidden + out_size)
    stream_bytes = 2 * 4 * tb * (in_size + out_size)      # double-buffered x / out tiles
    interm_bytes = 4 * tb * (2 * hidden + out_size)        # f32 activations
    vmem_bytes = int(min(max(3 * (weight_bytes + stream_bytes + interm_bytes),
                             8 << 20), 40 << 20))

    cost = pl.CostEstimate(
        flops=2 * B * (in_size * hidden + hidden * hidden + hidden * out_size),
        transcendentals=B * out_size,
        bytes_accessed=4 * (B * in_size
                            + in_size * hidden + hidden * hidden + hidden * out_size
                            + 2 * hidden + out_size
                            + B * out_size),
    )

    return pl.pallas_call(
        _actor_kernel,
        out_shape=jax.ShapeDtypeStruct((B, out_size), jnp.float32),
        grid=grid,
        in_specs=[
            pl.BlockSpec((tb, in_size), lambda i: (i, 0)),        # state tile (streams)
            pl.BlockSpec((in_size, hidden), lambda i: (0, 0)),    # w1 (resident)
            pl.BlockSpec((1, hidden), lambda i: (0, 0)),          # b1 (resident)
            pl.BlockSpec((hidden, hidden), lambda i: (0, 0)),     # w2 (resident)
            pl.BlockSpec((1, hidden), lambda i: (0, 0)),          # b2 (resident)
            pl.BlockSpec((hidden, out_size), lambda i: (0, 0)),   # w3 (resident)
            pl.BlockSpec((1, out_size), lambda i: (0, 0)),        # b3 (resident)
        ],
        out_specs=pl.BlockSpec((tb, out_size), lambda i: (i, 0)),
        compiler_params=pltpu.CompilerParams(
            dimension_semantics=("parallel",),
            vmem_limit_bytes=vmem_bytes,
        ),
        cost_estimate=cost,
    )(state, w1, b1, w2, b2, w3, b3)


def init_actor_params(key, input_size, hidden_size, output_size):
    """Deterministic init mimicking PyTorch nn.Linear default (U[-1/sqrt(fan_in), ...])."""
    ks = jax.random.split(key, 6)

    def linear(kw, kb, fan_in, fan_out):
        bound = 1.0 / jnp.sqrt(jnp.float32(fan_in))
        w = jax.random.uniform(kw, (fan_in, fan_out), jnp.float32, -bound, bound)
        b = jax.random.uniform(kb, (1, fan_out), jnp.float32, -bound, bound)
        return w, b

    w1, b1 = linear(ks[0], ks[1], input_size, hidden_size)
    w2, b2 = linear(ks[2], ks[3], hidden_size, hidden_size)
    w3, b3 = linear(ks[4], ks[5], hidden_size, output_size)
    return w1, b1, w2, b2, w3, b3


if __name__ == "__main__":
    input_size, hidden_size, output_size = 16, 32, 8

    key = jax.random.PRNGKey(0)
    k_state, k_params = jax.random.split(key)
    params = init_actor_params(k_params, input_size, hidden_size, output_size)

    # Batch large enough to exercise the Pallas path (and a >=2-step batch grid).
    batch = 256
    state = jax.random.normal(k_state, (batch, input_size), jnp.float32)

    out = jax.block_until_ready(actor_forward(state, *params))
    ref = _reference_mlp(state, *params)

    assert out.shape == (batch, output_size)
    # Tolerance covers possible differences in MXU vs XLA f32-matmul pass precision.
    assert jnp.allclose(out, ref, atol=1e-2, rtol=1e-2)
    assert bool(jnp.all(jnp.abs(out) <= 1.0))

    # Small-batch fast path (pure XLA) keeps identical semantics.
    small_state = state[:8]
    out_small = jax.block_until_ready(actor_forward(small_state, *params))
    assert out_small.shape == (8, output_size)
    assert jnp.allclose(out_small, _reference_mlp(small_state, *params),
                        atol=1e-5, rtol=1e-5)

    print("KERNEL_OK")
</pallas_src>

<mosaic_0001>
module attributes {stable_mosaic.version = 11 : i64} {
  func.func @_actor_kernel(%arg0: i32, %arg1: memref<128x16xf32, #tpu.memory_space<vmem>>, %arg2: memref<16x32xf32, #tpu.memory_space<vmem>>, %arg3: memref<1x32xf32, #tpu.memory_space<vmem>>, %arg4: memref<32x32xf32, #tpu.memory_space<vmem>>, %arg5: memref<1x32xf32, #tpu.memory_space<vmem>>, %arg6: memref<32x8xf32, #tpu.memory_space<vmem>>, %arg7: memref<1x8xf32, #tpu.memory_space<vmem>>, %arg8: memref<128x8xf32, #tpu.memory_space<vmem>>) attributes {dimension_semantics = [#tpu.dimension_semantics<parallel>], iteration_bounds = array<i64: 2>, scalar_prefetch = 0 : i64, scratch_operands = 0 : i64, tpu.core_type = #tpu.core_type<tc>, window_params = [{transform_indices = @transform_0, window_bounds = array<i64: 128, 16>}, {pipeline_mode = #tpu.pipeline_mode<synchronous>, transform_indices = @transform_1, window_bounds = array<i64: 16, 32>}, {pipeline_mode = #tpu.pipeline_mode<synchronous>, transform_indices = @transform_2, window_bounds = array<i64: 1, 32>}, {pipeline_mode = #tpu.pipeline_mode<synchronous>, transform_indices = @transform_3, window_bounds = array<i64: 32, 32>}, {pipeline_mode = #tpu.pipeline_mode<synchronous>, transform_indices = @transform_4, window_bounds = array<i64: 1, 32>}, {pipeline_mode = #tpu.pipeline_mode<synchronous>, transform_indices = @transform_5, window_bounds = array<i64: 32, 8>}, {pipeline_mode = #tpu.pipeline_mode<synchronous>, transform_indices = @transform_6, window_bounds = array<i64: 1, 8>}, {transform_indices = @transform_7, window_bounds = array<i64: 128, 8>}]} {
    %c0 = arith.constant 0 : index
    %c0_0 = arith.constant 0 : index
    %0 = vector.load %arg1[%c0, %c0_0] : memref<128x16xf32, #tpu.memory_space<vmem>>, vector<128x16xf32>
    %c0_1 = arith.constant 0 : index
    %c0_2 = arith.constant 0 : index
    %1 = vector.load %arg2[%c0_1, %c0_2] : memref<16x32xf32, #tpu.memory_space<vmem>>, vector<16x32xf32>
    %cst = arith.constant dense<0.000000e+00> : vector<128x32xf32>
    %2 = tpu.matmul %0, %1, %cst {dimension_numbers = #tpu.dot_dimension_numbers<[1], [0], [0], [1], [0, 0, 1, 1], [], []>} : vector<128x16xf32>, vector<16x32xf32>, vector<128x32xf32> -> vector<128x32xf32>
    %c0_3 = arith.constant 0 : index
    %c0_4 = arith.constant 0 : index
    %3 = vector.load %arg3[%c0_3, %c0_4] : memref<1x32xf32, #tpu.memory_space<vmem>>, vector<1x32xf32>
    %4 = vector.broadcast %3 : vector<1x32xf32> to vector<128x32xf32>
    %5 = arith.addf %2, %4 : vector<128x32xf32>
    %cst_5 = arith.constant 0.000000e+00 : f32
    %6 = vector.broadcast %cst_5 : f32 to vector<128x32xf32>
    %7 = arith.maximumf %5, %6 : vector<128x32xf32>
    %c0_6 = arith.constant 0 : index
    %c0_7 = arith.constant 0 : index
    %8 = vector.load %arg4[%c0_6, %c0_7] : memref<32x32xf32, #tpu.memory_space<vmem>>, vector<32x32xf32>
    %cst_8 = arith.constant dense<0.000000e+00> : vector<128x32xf32>
    %9 = tpu.matmul %7, %8, %cst_8 {dimension_numbers = #tpu.dot_dimension_numbers<[1], [0], [0], [1], [0, 0, 1, 1], [], []>} : vector<128x32xf32>, vector<32x32xf32>, vector<128x32xf32> -> vector<128x32xf32>
    %c0_9 = arith.constant 0 : index
    %c0_10 = arith.constant 0 : index
    %10 = vector.load %arg5[%c0_9, %c0_10] : memref<1x32xf32, #tpu.memory_space<vmem>>, vector<1x32xf32>
    %11 = vector.broadcast %10 : vector<1x32xf32> to vector<128x32xf32>
    %12 = arith.addf %9, %11 : vector<128x32xf32>
    %cst_11 = arith.constant 0.000000e+00 : f32
    %13 = vector.broadcast %cst_11 : f32 to vector<128x32xf32>
    %14 = arith.maximumf %12, %13 : vector<128x32xf32>
    %c0_12 = arith.constant 0 : index
    %c0_13 = arith.constant 0 : index
    %15 = vector.load %arg6[%c0_12, %c0_13] : memref<32x8xf32, #tpu.memory_space<vmem>>, vector<32x8xf32>
    %cst_14 = arith.constant dense<0.000000e+00> : vector<128x8xf32>
    %16 = tpu.matmul %14, %15, %cst_14 {dimension_numbers = #tpu.dot_dimension_numbers<[1], [0], [0], [1], [0, 0, 1, 1], [], []>} : vector<128x32xf32>, vector<32x8xf32>, vector<128x8xf32> -> vector<128x8xf32>
    %c0_15 = arith.constant 0 : index
    %c0_16 = arith.constant 0 : index
    %17 = vector.load %arg7[%c0_15, %c0_16] : memref<1x8xf32, #tpu.memory_space<vmem>>, vector<1x8xf32>
    %18 = vector.broadcast %17 : vector<1x8xf32> to vector<128x8xf32>
    %19 = arith.addf %16, %18 : vector<128x8xf32>
    %20 = math.tanh %19 : vector<128x8xf32>
    %c0_17 = arith.constant 0 : index
    %c0_18 = arith.constant 0 : index
    %21 = vector.load %arg8[%c0_17, %c0_18] : memref<128x8xf32, #tpu.memory_space<vmem>>, vector<128x8xf32>
    tpu.vector_store %arg8[%c0_17, %c0_18], %20 {strides = array<i32>} : memref<128x8xf32, #tpu.memory_space<vmem>>, vector<128x8xf32>,
    return
  }
  func.func @transform_0(%arg0: i32) -> (i32, i32) {
    %c0_i32 = arith.constant 0 : i32
    %c0_i32_0 = arith.constant 0 : i32
    return %arg0, %c0_i32 : i32, i32
  }
  func.func @transform_1(%arg0: i32) -> (i32, i32) {
    %c0_i32 = arith.constant 0 : i32
    %c0_i32_0 = arith.constant 0 : i32
    %c0_i32_1 = arith.constant 0 : i32
    return %c0_i32, %c0_i32_0 : i32, i32
  }
  func.func @transform_2(%arg0: i32) -> (i32, i32) {
    %c0_i32 = arith.constant 0 : i32
    %c0_i32_0 = arith.constant 0 : i32
    %c0_i32_1 = arith.constant 0 : i32
    return %c0_i32, %c0_i32_0 : i32, i32
  }
  func.func @transform_3(%arg0: i32) -> (i32, i32) {
    %c0_i32 = arith.constant 0 : i32
    %c0_i32_0 = arith.constant 0 : i32
    %c0_i32_1 = arith.constant 0 : i32
    return %c0_i32, %c0_i32_0 : i32, i32
  }
  func.func @transform_4(%arg0: i32) -> (i32, i32) {
    %c0_i32 = arith.constant 0 : i32
    %c0_i32_0 = arith.constant 0 : i32
    %c0_i32_1 = arith.constant 0 : i32
    return %c0_i32, %c0_i32_0 : i32, i32
  }
  func.func @transform_5(%arg0: i32) -> (i32, i32) {
    %c0_i32 = arith.constant 0 : i32
    %c0_i32_0 = arith.constant 0 : i32
    %c0_i32_1 = arith.constant 0 : i32
    return %c0_i32, %c0_i32_0 : i32, i32
  }
  func.func @transform_6(%arg0: i32) -> (i32, i32) {
    %c0_i32 = arith.constant 0 : i32
    %c0_i32_0 = arith.constant 0 : i32
    %c0_i32_1 = arith.constant 0 : i32
    return %c0_i32, %c0_i32_0 : i32, i32
  }
  func.func @transform_7(%arg0: i32) -> (i32, i32) {
    %c0_i32 = arith.constant 0 : i32
    %c0_i32_0 = arith.constant 0 : i32
    return %arg0, %c0_i32 : i32, i32
  }
}

</mosaic_0001>

<bundles_post_ra>
// kernel: actor_forward.1
= control target key start
LH: loop header
LB: loop body
LE: loop exit
PB: predicated region body
PF: predicated region fallthrough
CT: control target
= control target key end

     0   :  { %s942_s24 = smov 0   ;;  %s1141_s0 = inlined_call_operand.vmem [shape: f32[256,16], index: 0, kind: input, shape index: {}]   ;;  %s1142_s1 = inlined_call_operand.vmem [shape: f32[16,32], index: 1, kind: input, shape index: {}]   ;;  %s1143_s2 = inlined_call_operand.vmem [shape: f32[1,32], index: 2, kind: input, shape index: {}]   ;;  %s1144_s3 = inlined_call_operand.vmem [shape: f32[32,32], index: 3, kind: input, shape index: {}]   ;;  %s1145_s4 = inlined_call_operand.vmem [shape: f32[1,32], index: 4, kind: input, shape index: {}]   ;;  %s1146_s5 = inlined_call_operand.vmem [shape: f32[32,8], index: 5, kind: input, shape index: {}]   ;;  %s1147_s6 = inlined_call_operand.vmem [shape: f32[1,8], index: 6, kind: input, shape index: {}]   ;;  %s1148_s7 = inlined_call_operand.vmem [shape: f32[256,8], index: 7, kind: output, shape index: {}]  }
   0x1 LB: > { %s782_s25 = sadd.s32 4294967295, %s900_s24   ;;  %p786_p0 = scmp.ge.s32.totalorder %s900_s24, 1  ;;  %s900_s24 = sphi %s942_s24, %s17_s24  }
   0x2   : > { %p238_p1 = scmp.lt.s32.totalorder %s900_s24, 3 }
   0x4   : > { %p239_p2 = pnand %p786_p0, %p238_p1 }
   0x5   : > { %s787_s30 = sshll.u32 (!%p239_p2), %s782_s25, 4 }
   0x6   : > { %242 = sbr.rel (%p239_p2) target bundleno = 543 (0x21f), region = 48  ;;  %p271_p3 = scmp.lt.s32.totalorder (!%p239_p2), %s787_s30, 31 }
   0xb   : > { %v299_v0 = vld [vmem:[%s1142_s1 + $0x8] sm:$0xff]  ;;  %v298_v1 = vld [vmem:[%s1142_s1] sm:$0xff]  ;;  %s1150_s30 = smov (!%p271_p3, %s787_s30), 31  ;;  %vm304_vm0 = vcmask 130048   ;;  %v437_v12 = vld [vmem:[%s1144_s3 + $0x18] sm:$0xff]  ;;  %vm442_vm1 = vcmask 261120  }
   0xc   : > { %367 = vmatpush.msra.mxu0 %v299_v0  ;;  %841 = vmatpush.msra.mxu3 %v299_v0  ;;  %s788_s8 = sshll.u32 %s1150_s30, 3  ;;  %v436_v18 = vld [vmem:[%s1144_s3 + $0x10] sm:$0xff]  ;;  %v435_v20 = vld [vmem:[%s1144_s3 + $0x8] sm:$0xff]  ;;  %v434_v21 = vld [vmem:[%s1144_s3] sm:$0xff]  ;;  %vm709_vm2 = vcmask 64512  }
   0xd   : > { %s964_s11 = scalar_lea.vmem %s1141_s0, %s788_s8  ;;  %503 = vmatpush.msra.mxu1 %v437_v12  ;;  %v1013_v22 = vld [vmem:[%s1143_s2] ss:$0 sm:$0xff]  ;;  %v575_v59 = vld [vmem:[%s1146_s5 + $0x18] sm:$0xff]  ;;  %v574_v63 = vld [vmem:[%s1146_s5 + $0x10] sm:$0xff]  ;;  %s1089_s16 = scalar_lea.vmem %s1148_s7, %s788_s8 }
   0xe   : > { %368 = vmatpush.msra.mxu0 %v298_v1  ;;  %842 = vmatpush.msra.mxu3 %v298_v1  ;;  %v282_v2 = vld [vmem:[%s964_s11] sm:$0xff]  ;;  %v283_v3 = vld [vmem:[%s964_s11 + $0x8] sm:$0xff]  ;;  %v284_v4 = vld [vmem:[%s964_s11 + $0x10] sm:$0xff] }
   0xf   : > { %791 = vmatmul.msk.f32.vlgmr.msra.gmra.mxu0 %vm304_vm0, %v282_v2  ;;  %v285_v5 = vld [vmem:[%s964_s11 + $0x18] sm:$0xff]  ;;  %v286_v6 = vld [vmem:[%s964_s11 + $0x20] sm:$0xff]  ;;  %v287_v7 = vld [vmem:[%s964_s11 + $0x28] sm:$0xff]  ;;  %504 = vmatpush.msra.mxu1 %v436_v18 }
  0x10   : > { %v288_v8 = vld [vmem:[%s964_s11 + $0x30] sm:$0xff]  ;;  %v289_v9 = vld [vmem:[%s964_s11 + $0x38] sm:$0xff]  ;;  %v290_v10 = vld [vmem:[%s964_s11 + $0x40] sm:$0xff]  ;;  %843 = vmatpush.msrb.mxu3 %v437_v12  ;;  %640 = vmatpush.msra.mxu2 %v575_v59 }
  0x11   : > { %v295_v11 = vld [vmem:[%s964_s11 + $0x68] sm:$0xff]  ;;  %v296_v14 = vld [vmem:[%s964_s11 + $0x70] sm:$0xff]  ;;  %v297_v16 = vld [vmem:[%s964_s11 + $0x78] sm:$0xff]  ;;  %505 = vmatpush.msra.mxu1 %v435_v20 }
  0x12   : > { %804 = vmatmul.msk.f32.vlgmr.msra.gmra.mxu3 %vm304_vm0, %v295_v11  ;;  %v291_v13 = vld [vmem:[%s964_s11 + $0x48] sm:$0xff]  ;;  %v292_v15 = vld [vmem:[%s964_s11 + $0x50] sm:$0xff]  ;;  %v293_v17 = vld [vmem:[%s964_s11 + $0x58] sm:$0xff]  ;;  %641 = vmatpush.msra.mxu2 %v574_v63 }
  0x13   : > { %v294_v19 = vld [vmem:[%s964_s11 + $0x60] sm:$0xff]  ;;  %844 = vmatpush.msrb.mxu3 %v436_v18  ;;  %506 = vmatpush.msra.mxu1 %v434_v21  ;;  %v573_v1 = vld [vmem:[%s1146_s5 + $0x8] sm:$0xff] }
  0x14   : > { %642 = vmatpush.msra.mxu2 %v573_v1  ;;  %v860_v11 = vld [vmem:[%s1145_s4] ss:$0 sm:$0xff] }
  0x15   : > { %845 = vmatpush.msrb.mxu3 %v435_v20 }
  0x17   : > { %792 = vmatmul.msk.f32.gmra.mxu0 %vm304_vm0, %v283_v3  ;;  %846 = vmatpush.msrb.mxu3 %v434_v21  ;;  %v572_v3 = vld [vmem:[%s1146_s5] sm:$0xff] }
  0x18   : > { %643 = vmatpush.msra.mxu2 %v572_v3 }
  0x19   : > { %847 = vmatpush.msra.mxu3 %v575_v59 }
  0x1a   : > { %805 = vmatmul.msk.f32.gmra.mxu3 %vm304_vm0, %v296_v14 }
  0x1b   : > { %848 = vmatpush.msra.mxu3 %v574_v63 }
  0x1d   : > { %849 = vmatpush.msra.mxu3 %v573_v1 }
  0x1f   : > { %793 = vmatmul.msk.f32.gmra.mxu0 %vm304_vm0, %v284_v4  ;;  %850 = vmatpush.msra.mxu3 %v572_v3 }
  0x22   : > { %806 = vmatmul.msk.f32.gmra.mxu3 %vm304_vm0, %v297_v16 }
  0x27   : > { %794 = vmatmul.msk.f32.gmra.mxu0 %vm304_vm0, %v285_v5 }
  0x2f   : > { %795 = vmatmul.msk.f32.gmra.mxu0 %vm304_vm0, %v286_v6 }
  0x37   : > { %796 = vmatmul.msk.f32.gmra.mxu0 %vm304_vm0, %v287_v7 }
  0x3f   : > { %797 = vmatmul.msk.f32.gmra.mxu0 %vm304_vm0, %v288_v8 }
  0x47   : > { %798 = vmatmul.msk.f32.gmra.mxu0 %vm304_vm0, %v289_v9 }
  0x4f   : > { %799 = vmatmul.msk.f32.gmra.mxu0 %vm304_vm0, %v290_v10 }
  0x57   : > { %800 = vmatmul.msk.f32.gmra.mxu0 %vm304_vm0, %v291_v13 }
  0x5f   : > { %801 = vmatmul.msk.f32.gmra.mxu0 %vm304_vm0, %v292_v15 }
  0x67   : > { %802 = vmatmul.msk.f32.gmra.mxu0 %vm304_vm0, %v293_v17 }
  0x6f   : > { %803 = vmatmul.msk.f32.gmra.mxu0 %vm304_vm0, %v294_v19 }
  0x8c   : > { %v370_v23 = vpop.f32.mrf.mxu0 }
  0x8d   : > { %v371_v24 = vadd.f32 %v1013_v22, %v370_v23 }
  0x8f   : > { %v418_v25 = vmax.f32 %v371_v24, 0.0 }
  0x91   : > { %807 = vmatmul.msk.f32.vlgmr.msra.gmra.mxu1 %vm442_vm1, %v418_v25 }
  0x94   : > { %v373_v26 = vpop.f32.mrf.mxu0 }
  0x95   : > { %v374_v27 = vadd.f32 %v1013_v22, %v373_v26  ;;  %v409_v60 = vpop.f32.mrf.mxu3 }
  0x96   : > { %v410_v2 = vadd.f32 %v1013_v22, %v409_v60  ;;  %v1081_v60 = vld [vmem:[%s1147_s6] ss:$0 sm:$0xff] }
  0x97   : > { %v419_v28 = vmax.f32 %v374_v27, 0.0 }
  0x98   : > { %v431_v5 = vmax.f32 %v410_v2, 0.0 }
  0x99   : > { %808 = vmatmul.msk.f32.gmra.mxu1 %vm442_vm1, %v419_v28 }
  0x9c   : > { %v376_v29 = vpop.f32.mrf.mxu0 }
  0x9d   : > { %v377_v30 = vadd.f32 %v1013_v22, %v376_v29  ;;  %v412_v4 = vpop.f32.mrf.mxu3 }
  0x9e   : > { %v413_v6 = vadd.f32 %v1013_v22, %v412_v4 }
  0x9f   : > { %v420_v31 = vmax.f32 %v377_v30, 0.0 }
  0xa0   : > { %v432_v7 = vmax.f32 %v413_v6, 0.0 }
  0xa1   : > { %809 = vmatmul.msk.f32.gmra.mxu1 %vm442_vm1, %v420_v31 }
  0xa4   : > { %v379_v32 = vpop.f32.mrf.mxu0 }
  0xa5   : > { %v380_v33 = vadd.f32 %v1013_v22, %v379_v32  ;;  %v415_v8 = vpop.f32.mrf.mxu3 }
  0xa6   : > { %v416_v9 = vadd.f32 %v1013_v22, %v415_v8 }
  0xa7   : > { %v421_v34 = vmax.f32 %v380_v33, 0.0 }
  0xa8   : > { %v433_v10 = vmax.f32 %v416_v9, 0.0 }
  0xa9   : > { %810 = vmatmul.msk.f32.gmra.mxu1 %vm442_vm1, %v421_v34 }
  0xac   : > { %v382_v35 = vpop.f32.mrf.mxu0 }
  0xad   : > { %v383_v36 = vadd.f32 %v1013_v22, %v382_v35 }
  0xaf   : > { %v422_v37 = vmax.f32 %v383_v36, 0.0 }
  0xb1   : > { %811 = vmatmul.msk.f32.gmra.mxu1 %vm442_vm1, %v422_v37 }
  0xb4   : > { %v385_v38 = vpop.f32.mrf.mxu0 }
  0xb5   : > { %v386_v39 = vadd.f32 %v1013_v22, %v385_v38 }
  0xb7   : > { %v423_v40 = vmax.f32 %v386_v39, 0.0 }
  0xb9   : > { %812 = vmatmul.msk.f32.gmra.mxu1 %vm442_vm1, %v423_v40 }
  0xbc   : > { %v388_v41 = vpop.f32.mrf.mxu0 }
  0xbd   : > { %v389_v42 = vadd.f32 %v1013_v22, %v388_v41 }
  0xbf   : > { %v424_v43 = vmax.f32 %v389_v42, 0.0 }
  0xc1   : > { %813 = vmatmul.msk.f32.gmra.mxu1 %vm442_vm1, %v424_v43 }
  0xc4   : > { %v391_v44 = vpop.f32.mrf.mxu0 }
  0xc5   : > { %v392_v45 = vadd.f32 %v1013_v22, %v391_v44 }
  0xc7   : > { %v425_v46 = vmax.f32 %v392_v45, 0.0 }
  0xc9   : > { %814 = vmatmul.msk.f32.gmra.mxu1 %vm442_vm1, %v425_v46 }
  0xcc   : > { %v394_v47 = vpop.f32.mrf.mxu0 }
  0xcd   : > { %v395_v48 = vadd.f32 %v1013_v22, %v394_v47 }
  0xcf   : > { %v426_v49 = vmax.f32 %v395_v48, 0.0 }
  0xd1   : > { %815 = vmatmul.msk.f32.gmra.mxu1 %vm442_vm1, %v426_v49 }
  0xd4   : > { %v397_v50 = vpop.f32.mrf.mxu0 }
  0xd5   : > { %v398_v51 = vadd.f32 %v1013_v22, %v397_v50 }
  0xd7   : > { %v427_v52 = vmax.f32 %v398_v51, 0.0 }
  0xd9   : > { %816 = vmatmul.msk.f32.gmra.mxu1 %vm442_vm1, %v427_v52 }
  0xdc   : > { %v400_v53 = vpop.f32.mrf.mxu0 }
  0xdd   : > { %v401_v54 = vadd.f32 %v1013_v22, %v400_v53 }
  0xdf   : > { %v428_v55 = vmax.f32 %v401_v54, 0.0 }
  0xe1   : > { %817 = vmatmul.msk.f32.gmra.mxu1 %vm442_vm1, %v428_v55 }
  0xe4   : > { %v403_v56 = vpop.f32.mrf.mxu0 }
  0xe5   : > { %v404_v57 = vadd.f32 %v1013_v22, %v403_v56 }
  0xe7   : > { %v429_v58 = vmax.f32 %v404_v57, 0.0 }
  0xe9   : > { %818 = vmatmul.msk.f32.gmra.mxu1 %vm442_vm1, %v429_v58 }
  0xec   : > { %v406_v61 = vpop.f32.mrf.mxu0 }
  0xed   : > { %v407_v62 = vadd.f32 %v1013_v22, %v406_v61 }
  0xef   : > { %v430_v0 = vmax.f32 %v407_v62, 0.0 }
  0xf1   : > { %819 = vmatmul.msk.f32.vlgmr.msrb.gmra.mxu3 %vm442_vm1, %v430_v0 }
  0xf9   : > { %820 = vmatmul.msk.f32.gmra.mxu3 %vm442_vm1, %v431_v5 }
 0x101   : > { %821 = vmatmul.msk.f32.gmra.mxu3 %vm442_vm1, %v432_v7 }
 0x109   : > { %822 = vmatmul.msk.f32.gmra.mxu3 %vm442_vm1, %v433_v10 }
 0x10e   : > { %v508_v12 = vpop.f32.mrf.mxu1 }
 0x10f   : > { %v509_v13 = vadd.f32 %v860_v11, %v508_v12 }
 0x111   : > { %v556_v14 = vmax.f32 %v509_v13, 0.0 }
 0x113   : > { %823 = vmatmul.msk.f32.vlgmr.msra.gmra.mxu2 %vm442_vm1, %v556_v14 }
 0x116   : > { %v511_v15 = vpop.f32.mrf.mxu1 }
 0x117   : > { %v512_v16 = vadd.f32 %v860_v11, %v511_v15 }
 0x119   : > { %v557_v17 = vmax.f32 %v512_v16, 0.0 }
 0x11b   : > { %824 = vmatmul.msk.f32.gmra.mxu2 %vm442_vm1, %v557_v17 }
 0x11e   : > { %v514_v18 = vpop.f32.mrf.mxu1 }
 0x11f   : > { %v515_v19 = vadd.f32 %v860_v11, %v514_v18 }
 0x121   : > { %v558_v20 = vmax.f32 %v515_v19, 0.0 }
 0x123   : > { %825 = vmatmul.msk.f32.gmra.mxu2 %vm442_vm1, %v558_v20 }
 0x126   : > { %v517_v21 = vpop.f32.mrf.mxu1 }
 0x127   : > { %v518_v22 = vadd.f32 %v860_v11, %v517_v21 }
 0x129   : > { %v559_v23 = vmax.f32 %v518_v22, 0.0 }
 0x12b   : > { %826 = vmatmul.msk.f32.gmra.mxu2 %vm442_vm1, %v559_v23 }
 0x12e   : > { %v520_v24 = vpop.f32.mrf.mxu1 }
 0x12f   : > { %v521_v25 = vadd.f32 %v860_v11, %v520_v24 }
 0x131   : > { %v560_v26 = vmax.f32 %v521_v25, 0.0 }
 0x133   : > { %827 = vmatmul.msk.f32.gmra.mxu2 %vm442_vm1, %v560_v26 }
 0x136   : > { %v523_v27 = vpop.f32.mrf.mxu1 }
 0x137   : > { %v524_v28 = vadd.f32 %v860_v11, %v523_v27 }
 0x139   : > { %v561_v29 = vmax.f32 %v524_v28, 0.0 }
 0x13b   : > { %828 = vmatmul.msk.f32.gmra.mxu2 %vm442_vm1, %v561_v29 }
 0x13e   : > { %v526_v30 = vpop.f32.mrf.mxu1 }
 0x13f   : > { %v527_v31 = vadd.f32 %v860_v11, %v526_v30 }
 0x141   : > { %v562_v32 = vmax.f32 %v527_v31, 0.0 }
 0x143   : > { %829 = vmatmul.msk.f32.gmra.mxu2 %vm442_vm1, %v562_v32 }
 0x146   : > { %v529_v33 = vpop.f32.mrf.mxu1 }
 0x147   : > { %v530_v34 = vadd.f32 %v860_v11, %v529_v33 }
 0x149   : > { %v563_v35 = vmax.f32 %v530_v34, 0.0 }
 0x14b   : > { %830 = vmatmul.msk.f32.gmra.mxu2 %vm442_vm1, %v563_v35 }
 0x14e   : > { %v532_v36 = vpop.f32.mrf.mxu1 }
 0x14f   : > { %v533_v37 = vadd.f32 %v860_v11, %v532_v36 }
 0x151   : > { %v564_v38 = vmax.f32 %v533_v37, 0.0 }
 0x153   : > { %831 = vmatmul.msk.f32.gmra.mxu2 %vm442_vm1, %v564_v38 }
 0x156   : > { %v535_v39 = vpop.f32.mrf.mxu1 }
 0x157   : > { %v536_v40 = vadd.f32 %v860_v11, %v535_v39 }
 0x159   : > { %v565_v41 = vmax.f32 %v536_v40, 0.0 }
 0x15b   : > { %832 = vmatmul.msk.f32.gmra.mxu2 %vm442_vm1, %v565_v41 }
 0x15e   : > { %v538_v42 = vpop.f32.mrf.mxu1 }
 0x15f   : > { %v539_v43 = vadd.f32 %v860_v11, %v538_v42 }
 0x161   : > { %v566_v44 = vmax.f32 %v539_v43, 0.0 }
 0x163   : > { %833 = vmatmul.msk.f32.gmra.mxu2 %vm442_vm1, %v566_v44 }
 0x166   : > { %v541_v45 = vpop.f32.mrf.mxu1 }
 0x167   : > { %v542_v46 = vadd.f32 %v860_v11, %v541_v45 }
 0x169   : > { %v567_v47 = vmax.f32 %v542_v46, 0.0 }
 0x16b   : > { %834 = vmatmul.msk.f32.gmra.mxu2 %vm442_vm1, %v567_v47 }
 0x174   : > { %v544_v48 = vpop.f32.mrf.mxu3 }
 0x175   : > { %v545_v49 = vadd.f32 %v860_v11, %v544_v48 }
 0x177   : > { %v568_v50 = vmax.f32 %v545_v49, 0.0 }
 0x179   : > { %835 = vmatmul.msk.f32.vlgmr.msra.gmra.mxu3 %vm442_vm1, %v568_v50 }
 0x17c   : > { %v547_v51 = vpop.f32.mrf.mxu3 }
 0x17d   : > { %v548_v52 = vadd.f32 %v860_v11, %v547_v51 }
 0x17f   : > { %v569_v53 = vmax.f32 %v548_v52, 0.0 }
 0x181   : > { %836 = vmatmul.msk.f32.gmra.mxu3 %vm442_vm1, %v569_v53 }
 0x184   : > { %v550_v54 = vpop.f32.mrf.mxu3 }
 0x185   : > { %v551_v55 = vadd.f32 %v860_v11, %v550_v54 }
 0x187   : > { %v570_v56 = vmax.f32 %v551_v55, 0.0 }
 0x189   : > { %837 = vmatmul.msk.f32.gmra.mxu3 %vm442_vm1, %v570_v56 }
 0x18c   : > { %v553_v57 = vpop.f32.mrf.mxu3 }
 0x18d   : > { %v554_v58 = vadd.f32 %v860_v11, %v553_v57 }
 0x18f   : > { %v571_v59 = vmax.f32 %v554_v58, 0.0 }
 0x191   : > { %838 = vmatmul.msk.f32.gmra.mxu3 %vm442_vm1, %v571_v59 }
 0x196   : > { %v645_v61 = vpop.f32.mrf.mxu2 }
 0x197   : > { %v646_v62 = vadd.f32 %v1081_v60, %v645_v61 }
 0x199   : > { %862 = vtanh.f32 %v646_v62 }
 0x19e   : > { %v648_v63 = vpop.f32.mrf.mxu2 }
 0x19f   : > { %v863_v0 = vpop.eup %862  ;;  %v649_v1 = vadd.f32 %v1081_v60, %v648_v63 }
 0x1a0   : > { %710 = vst.msk [vmem:[%s1089_s16] sm:$0xff] %vm709_vm2, %v863_v0 }
 0x1a1   : > { %864 = vtanh.f32 %v649_v1 }
 0x1a6   : > { %v651_v2 = vpop.f32.mrf.mxu2 }
 0x1a7   : > { %v865_v3 = vpop.eup %864  ;;  %v652_v4 = vadd.f32 %v1081_v60, %v651_v2 }
 0x1a8   : > { %711 = vst.msk [vmem:[%s1089_s16 + $0x8] sm:$0xff] %vm709_vm2, %v865_v3 }
 0x1a9   : > { %866 = vtanh.f32 %v652_v4 }
 0x1ae   : > { %v654_v5 = vpop.f32.mrf.mxu2 }
 0x1af   : > { %v867_v6 = vpop.eup %866  ;;  %v655_v7 = vadd.f32 %v1081_v60, %v654_v5 }
 0x1b0   : > { %712 = vst.msk [vmem:[%s1089_s16 + $0x10] sm:$0xff] %vm709_vm2, %v867_v6 }
 0x1b1   : > { %868 = vtanh.f32 %v655_v7 }
 0x1b6   : > { %v657_v8 = vpop.f32.mrf.mxu2 }
 0x1b7   : > { %v869_v9 = vpop.eup %868  ;;  %v658_v10 = vadd.f32 %v1081_v60, %v657_v8 }
 0x1b8   : > { %713 = vst.msk [vmem:[%s1089_s16 + $0x18] sm:$0xff] %vm709_vm2, %v869_v9 }
 0x1b9   : > { %870 = vtanh.f32 %v658_v10 }
 0x1be   : > { %v660_v11 = vpop.f32.mrf.mxu2 }
 0x1bf   : > { %v871_v12 = vpop.eup %870  ;;  %v661_v13 = vadd.f32 %v1081_v60, %v660_v11 }
 0x1c0   : > { %714 = vst.msk [vmem:[%s1089_s16 + $0x20] sm:$0xff] %vm709_vm2, %v871_v12 }
 0x1c1   : > { %872 = vtanh.f32 %v661_v13 }
 0x1c6   : > { %v663_v14 = vpop.f32.mrf.mxu2 }
 0x1c7   : > { %v873_v15 = vpop.eup %872  ;;  %v664_v16 = vadd.f32 %v1081_v60, %v663_v14 }
 0x1c8   : > { %715 = vst.msk [vmem:[%s1089_s16 + $0x28] sm:$0xff] %vm709_vm2, %v873_v15 }
 0x1c9   : > { %874 = vtanh.f32 %v664_v16 }
 0x1ce   : > { %v666_v17 = vpop.f32.mrf.mxu2 }
 0x1cf   : > { %v875_v18 = vpop.eup %874  ;;  %v667_v19 = vadd.f32 %v1081_v60, %v666_v17 }
 0x1d0   : > { %716 = vst.msk [vmem:[%s1089_s16 + $0x30] sm:$0xff] %vm709_vm2, %v875_v18 }
 0x1d1   : > { %876 = vtanh.f32 %v667_v19 }
 0x1d6   : > { %v669_v20 = vpop.f32.mrf.mxu2 }
 0x1d7   : > { %v877_v21 = vpop.eup %876  ;;  %v670_v22 = vadd.f32 %v1081_v60, %v669_v20 }
 0x1d8   : > { %717 = vst.msk [vmem:[%s1089_s16 + $0x38] sm:$0xff] %vm709_vm2, %v877_v21 }
 0x1d9   : > { %878 = vtanh.f32 %v670_v22 }
 0x1de   : > { %v672_v23 = vpop.f32.mrf.mxu2 }
 0x1df   : > { %v879_v24 = vpop.eup %878  ;;  %v673_v25 = vadd.f32 %v1081_v60, %v672_v23 }
 0x1e0   : > { %718 = vst.msk [vmem:[%s1089_s16 + $0x40] sm:$0xff] %vm709_vm2, %v879_v24 }
 0x1e1   : > { %880 = vtanh.f32 %v673_v25 }
 0x1e6   : > { %v675_v26 = vpop.f32.mrf.mxu2 }
 0x1e7   : > { %v881_v27 = vpop.eup %880  ;;  %v676_v28 = vadd.f32 %v1081_v60, %v675_v26 }
 0x1e8   : > { %719 = vst.msk [vmem:[%s1089_s16 + $0x48] sm:$0xff] %vm709_vm2, %v881_v27 }
 0x1e9   : > { %882 = vtanh.f32 %v676_v28 }
 0x1ee   : > { %v678_v29 = vpop.f32.mrf.mxu2 }
 0x1ef   : > { %v883_v30 = vpop.eup %882  ;;  %v679_v31 = vadd.f32 %v1081_v60, %v678_v29 }
 0x1f0   : > { %720 = vst.msk [vmem:[%s1089_s16 + $0x50] sm:$0xff] %vm709_vm2, %v883_v30 }
 0x1f1   : > { %884 = vtanh.f32 %v679_v31 }
 0x1f7   : > { %v885_v32 = vpop.eup %884 }
 0x1f8   : > { %721 = vst.msk [vmem:[%s1089_s16 + $0x58] sm:$0xff] %vm709_vm2, %v885_v32 }
 0x1fc   : > { %v681_v33 = vpop.f32.mrf.mxu3 }
 0x1fd   : > { %v682_v34 = vadd.f32 %v1081_v60, %v681_v33 }
 0x1ff   : > { %886 = vtanh.f32 %v682_v34 }
 0x204   : > { %v684_v35 = vpop.f32.mrf.mxu3 }
 0x205   : > { %v887_v36 = vpop.eup %886  ;;  %v685_v37 = vadd.f32 %v1081_v60, %v684_v35 }
 0x206   : > { %722 = vst.msk [vmem:[%s1089_s16 + $0x60] sm:$0xff] %vm709_vm2, %v887_v36 }
 0x207   : > { %888 = vtanh.f32 %v685_v37 }
 0x20c   : > { %v687_v38 = vpop.f32.mrf.mxu3 }
 0x20d   : > { %v889_v39 = vpop.eup %888  ;;  %v688_v40 = vadd.f32 %v1081_v60, %v687_v38 }
 0x20e   : > { %723 = vst.msk [vmem:[%s1089_s16 + $0x68] sm:$0xff] %vm709_vm2, %v889_v39 }
 0x20f   : > { %890 = vtanh.f32 %v688_v40 }
 0x214   : > { %v690_v41 = vpop.f32.mrf.mxu3 }
 0x215   : > { %v891_v42 = vpop.eup %890  ;;  %v691_v43 = vadd.f32 %v1081_v60, %v690_v41 }
 0x216   : > { %724 = vst.msk [vmem:[%s1089_s16 + $0x70] sm:$0xff] %vm709_vm2, %v891_v42 }
 0x217   : > { %892 = vtanh.f32 %v691_v43 }
 0x21d   : > { %v893_v44 = vpop.eup %892 }
 0x21e   : > { %725 = vst.msk [vmem:[%s1089_s16 + $0x78] sm:$0xff] %vm709_vm2, %v893_v44 }
 0x21f PF: > { %s17_s24 = sadd.s32 1, %s900_s24  }
 0x220   : > { %p14_p4 = scmp.ge.s32.totalorder %s17_s24, 4  }
 0x222   :  { %16 = sbr.rel (!%p14_p4) target bundleno = 1 (0x1), region = 78 }

</bundles_post_ra>
